<compile_context>
chip_gen: v7x
topology: tpu7x:2x2x1
jax: 0.10.0
libtpu: 0.0.40
codegen_flags: <defaults>
</compile_context>

<pallas_src>
import functools

import jax
import jax.numpy as jnp
from jax import lax
from jax.experimental import pallas as pl
from jax.experimental.pallas import tpu as pltpu

NEG_INF = -1e30  # large finite negative; avoids NaN from exp(-inf - (-inf))


def _sublane_align(dtype):
    """Second-to-last-dim alignment: f32 packs 8 rows/vreg, bf16 16, int8/fp8 32."""
    return {4: 8, 2: 16, 1: 32}.get(jnp.dtype(dtype).itemsize, 8)


def _fit_tile(dim, pref, align):
    """Largest tile <= pref that divides `dim` and is a multiple of `align`.
    Falls back to the full dimension (always a legal BlockSpec block)."""
    t = min(pref, dim)
    t = (t // align) * align
    while t >= align:
        if dim % t == 0:
            return t
        t -= align
    return dim


def _vmem_limit(est_bytes):
    """Explicit scoped-VMEM budget.  >= default 32 MiB (no-risk for small tiles),
    capped at v7x's 64 MiB physical VMEM."""
    return int(min(max(est_bytes + (16 << 20), 32 << 20), 64 << 20))


# ----------------------------------------------------------------------------
# Kernel 1: tiled matmul  y = x @ w   (no bias -- module uses bias=False)
# ----------------------------------------------------------------------------
def _matmul_kernel(x_ref, w_ref, o_ref, acc_ref):
    @pl.when(pl.program_id(2) == 0)
    def _():
        acc_ref[...] = jnp.zeros(acc_ref.shape, acc_ref.dtype)

    acc_ref[...] += jnp.dot(x_ref[...], w_ref[...],
                            preferred_element_type=jnp.float32)

    @pl.when(pl.program_id(2) == pl.num_programs(2) - 1)
    def _():
        o_ref[...] = acc_ref[...].astype(o_ref.dtype)


def matmul(x, w, *, tm=512, tn=512, tk=1024, out_dtype=None):
    """x: (M, K) @ w: (K, N) -> (M, N); tiled + pipelined, f32 accumulation."""
    M, K = x.shape
    K2, N = w.shape
    assert K == K2
    out_dtype = out_dtype or x.dtype
    tm = _fit_tile(M, tm, _sublane_align(x.dtype))
    tn = _fit_tile(N, tn, 128)
    tk = _fit_tile(K, tk, 128)
    itemsize = jnp.dtype(x.dtype).itemsize
    o_itemsize = jnp.dtype(out_dtype).itemsize
    # double-buffered inputs + double-buffered output + f32 accumulator scratch
    est_vmem = (2 * itemsize * (tm * tk + tk * tn)
                + 2 * o_itemsize * tm * tn + 4 * tm * tn)
    cost = pl.CostEstimate(
        flops=2 * M * N * K,
        transcendentals=0,
        bytes_accessed=(M * K * (N // tn) + K * N * (M // tm) + M * N) * itemsize)
    return pl.pallas_call(
        _matmul_kernel,
        out_shape=jax.ShapeDtypeStruct((M, N), out_dtype),
        grid=(M // tm, N // tn, K // tk),
        in_specs=[
            pl.BlockSpec((tm, tk), lambda i, j, k: (i, k)),
            pl.BlockSpec((tk, tn), lambda i, j, k: (k, j)),
        ],
        out_specs=pl.BlockSpec((tm, tn), lambda i, j, k: (i, j)),
        scratch_shapes=[pltpu.VMEM((tm, tn), jnp.float32)],
        compiler_params=pltpu.CompilerParams(
            dimension_semantics=("parallel", "parallel", "arbitrary"),
            vmem_limit_bytes=_vmem_limit(est_vmem)),
        cost_estimate=cost,
    )(x, w)


# ----------------------------------------------------------------------------
# Kernel 2: RoPE + repack   (B, T, 3C) -> (3, B*H, T, Dh)
#   - q/k weight columns were pre-permuted to [even | odd] order, so the
#     interleaved RoPE of the module becomes a rotate-half.
#   - the softmax scale is folded into the q-side cos/sin tables.
# ----------------------------------------------------------------------------
def _rope_repack_kernel(x_ref, cq_ref, sq_ref, ck_ref, sk_ref, o_ref, *,
                        num_heads, head_dim, embed_dim):
    half = head_dim // 2
    cq = cq_ref[...]
    sq = sq_ref[...]
    ck = ck_ref[...]
    sk = sk_ref[...]

    def rotate_half(u):
        return jnp.concatenate([-u[:, half:], u[:, :half]], axis=-1)

    # Per-component slabs loaded at C-aligned offsets; heads sliced at value level.
    xq = x_ref[0, :, 0:embed_dim].astype(jnp.float32)
    xk = x_ref[0, :, embed_dim:2 * embed_dim].astype(jnp.float32)
    xv = x_ref[0, :, 2 * embed_dim:3 * embed_dim]

    for h in range(num_heads):
        sl = slice(h * head_dim, (h + 1) * head_dim)
        q = xq[:, sl]
        k = xk[:, sl]
        o_ref[0, h] = (q * cq + rotate_half(q) * sq).astype(o_ref.dtype)
        o_ref[1, h] = (k * ck + rotate_half(k) * sk).astype(o_ref.dtype)
        o_ref[2, h] = xv[:, sl]


def rope_repack(qkv3d, cos_q, sin_q, cos_k, sin_k, *, num_heads, tq=256):
    """qkv3d: (B, T, 3C) projection output.  cos_q/sin_q: (T, Dh) with the
    softmax scale folded in; cos_k/sin_k unscaled.  Returns (3, B*H, T, Dh)."""
    B, T, threeC = qkv3d.shape
    C = threeC // 3
    Dh = C // num_heads
    tq = _fit_tile(T, tq, _sublane_align(qkv3d.dtype))
    itemsize = jnp.dtype(qkv3d.dtype).itemsize
    est_vmem = 2 * itemsize * (tq * threeC + 3 * num_heads * tq * Dh) \
        + 8 * 4 * tq * Dh
    kernel = functools.partial(_rope_repack_kernel, num_heads=num_heads,
                               head_dim=Dh, embed_dim=C)
    return pl.pallas_call(
        kernel,
        out_shape=jax.ShapeDtypeStruct((3, B * num_heads, T, Dh), qkv3d.dtype),
        grid=(B, T // tq),
        in_specs=[
            pl.BlockSpec((1, tq, threeC), lambda b, i: (b, i, 0)),
            pl.BlockSpec((tq, Dh), lambda b, i: (i, 0)),  # cos_q (scaled)
            pl.BlockSpec((tq, Dh), lambda b, i: (i, 0)),  # sin_q (scaled)
            pl.BlockSpec((tq, Dh), lambda b, i: (i, 0)),  # cos_k
            pl.BlockSpec((tq, Dh), lambda b, i: (i, 0)),  # sin_k
        ],
        out_specs=pl.BlockSpec((3, num_heads, tq, Dh), lambda b, i: (0, b, i, 0)),
        compiler_params=pltpu.CompilerParams(
            dimension_semantics=("parallel", "parallel"),
            vmem_limit_bytes=_vmem_limit(est_vmem)),
    )(qkv3d, cos_q, sin_q, cos_k, sin_k)


# ----------------------------------------------------------------------------
# Kernel 3: flash attention (online softmax), all heads per block, causal
#           mask only on diagonal-straddling blocks, masked-block DMA skip,
#           output written directly in (B, T, C) layout.
# ----------------------------------------------------------------------------
def _flash_attn_kernel(q_ref, k_ref, v_ref, o_ref, m_scr, l_scr, acc_scr, *,
                       causal):
    qi = pl.program_id(1)
    ki = pl.program_id(2)
    _, H, tq, Dh = q_ref.shape
    tk = k_ref.shape[2]

    @pl.when(ki == 0)
    def _():
        m_scr[...] = jnp.full(m_scr.shape, NEG_INF, m_scr.dtype)
        l_scr[...] = jnp.zeros(l_scr.shape, l_scr.dtype)
        acc_scr[...] = jnp.zeros(acc_scr.shape, acc_scr.dtype)

    def make_body(mask_block):
        def body():
            q = q_ref[0]                       # (H, tq, Dh) -- RoPE pre-applied
            k = k_ref[0]                       # (H, tk, Dh)
            v = v_ref[0]                       # (H, tk, Dh)
            # QK^T batched over heads (scale pre-folded into q-side RoPE tables).
            s = jnp.einsum('hqd,hkd->hqk', q, k,
                           preferred_element_type=jnp.float32)
            if mask_block:
                row = qi * tq + lax.broadcasted_iota(jnp.int32, (tq, tk), 0)
                col = ki * tk + lax.broadcasted_iota(jnp.int32, (tq, tk), 1)
                s = jnp.where((row >= col)[None, :, :], s, NEG_INF)
            m_prev = m_scr[...]
            m_new = jnp.maximum(m_prev, jnp.max(s, axis=-1, keepdims=True))
            alpha = jnp.exp(m_prev - m_new)
            p = jnp.exp(s - m_new)
            l_scr[...] = alpha * l_scr[...] + jnp.sum(p, axis=-1, keepdims=True)
            acc_scr[...] = alpha * acc_scr[...] + jnp.einsum(
                'hqk,hkd->hqd', p.astype(v.dtype), v,
                preferred_element_type=jnp.float32)
            m_scr[...] = m_new
        return body

    if causal:
        min_row = qi * tq
        max_row = min_row + (tq - 1)
        min_col = ki * tk
        max_col = min_col + (tk - 1)
        # Fully below the diagonal -> no mask work at all.
        pl.when(max_col <= min_row)(make_body(mask_block=False))
        # Diagonal-straddling -> masked.  Fully-above-diagonal blocks run nothing.
        pl.when((max_col > min_row) & (min_col <= max_row))(
            make_body(mask_block=True))
    else:
        make_body(mask_block=False)()

    @pl.when(ki == pl.num_programs(2) - 1)
    def _():
        inv_l = pl.reciprocal(l_scr[...], approx=True)           # (H, tq, 1)
        out = (acc_scr[...] * inv_l).astype(o_ref.dtype)         # (H, tq, Dh)
        for h in range(H):                                       # static slices
            o_ref[0, :, h * Dh:(h + 1) * Dh] = out[h]


def flash_attention(qkv, *, batch, num_heads, causal=True, tq=512, tk=256):
    """qkv: (3, B*H, T, Dh) packed, RoPE (and softmax scale) already applied to
    q/k.  Returns attention output in (B, T, H*Dh) layout (no transposes)."""
    three, BH, T, Dh = qkv.shape
    assert three == 3 and BH == batch * num_heads
    C = num_heads * Dh
    sub = _sublane_align(qkv.dtype)
    tq = _fit_tile(T, tq, sub)
    tk = _fit_tile(T, tk, sub)
    nq, nk = T // tq, T // tk

    def q_map(b, qi, ki):
        return (0, b, qi, 0)

    def kv_map(which):
        def m(b, qi, ki):
            if causal:
                # Clamp fully-masked KV blocks to the last valid one so the
                # pipeline re-uses the previous buffer (DMA suppressed).
                last_valid = ((qi + 1) * tq - 1) // tk
                ki = jnp.minimum(ki, last_valid)
            return (which, b, ki, 0)
        return m

    itemsize = jnp.dtype(qkv.dtype).itemsize
    kv_reads = nq * (nk // 2 + 1) if causal else nq * nk
    cost = pl.CostEstimate(
        flops=4 * BH * T * T * Dh,
        transcendentals=BH * T * T,
        bytes_accessed=(BH * T * Dh                       # Q, once
                        + 2 * BH * kv_reads * tk * Dh     # K/V re-reads per q block
                        + batch * T * C) * itemsize)      # output
    est_vmem = (2 * itemsize * (num_heads * tq * Dh + 2 * num_heads * tk * Dh
                                + tq * C)
                + 4 * num_heads * tq * (Dh + 2))

    kernel = functools.partial(_flash_attn_kernel, causal=causal)
    return pl.pallas_call(
        kernel,
        out_shape=jax.ShapeDtypeStruct((batch, T, C), qkv.dtype),
        grid=(batch, nq, nk),
        in_specs=[
            pl.BlockSpec((1, num_heads, tq, Dh), q_map),     # q
            pl.BlockSpec((1, num_heads, tk, Dh), kv_map(1)),  # k
            pl.BlockSpec((1, num_heads, tk, Dh), kv_map(2)),  # v
        ],
        out_specs=pl.BlockSpec((1, tq, C), lambda b, qi, ki: (b, qi, 0)),
        scratch_shapes=[
            pltpu.VMEM((num_heads, tq, 1), jnp.float32),   # running max m
            pltpu.VMEM((num_heads, tq, 1), jnp.float32),   # running sum l
            pltpu.VMEM((num_heads, tq, Dh), jnp.float32),  # output accumulator
        ],
        compiler_params=pltpu.CompilerParams(
            dimension_semantics=("parallel", "parallel", "arbitrary"),
            vmem_limit_bytes=_vmem_limit(est_vmem)),
        cost_estimate=cost,
    )(qkv, qkv, qkv)


# ----------------------------------------------------------------------------
# Parameter prep + RoPE tables (done once, outside the hot path)
# ----------------------------------------------------------------------------
def rope_tables(T, head_dim, theta=10000.0):
    """cos/sin of shape (T, head_dim), halves duplicated (the module's
    cat([freqs, freqs], -1) buffers)."""
    inv_freq = 1.0 / (theta ** (jnp.arange(0, head_dim, 2, dtype=jnp.float32)
                                / head_dim))
    freqs = jnp.outer(jnp.arange(T, dtype=jnp.float32), inv_freq)  # (T, Dh/2)
    emb = jnp.concatenate([freqs, freqs], axis=-1)                 # (T, Dh)
    return jnp.cos(emb), jnp.sin(emb)


def prepare_params(w_qkv, w_proj, num_heads):
    """One-time prep: transpose both weights for `x @ w` kernels, and permute each
    head's q/k output columns to [even | odd] order so RoPE is a pure rotate-half
    (no strided lane gathers).  Q.K^T is invariant to this permutation."""
    C = w_qkv.shape[1]
    H = num_heads
    Dh = C // H
    perm = jnp.concatenate([jnp.arange(0, Dh, 2), jnp.arange(1, Dh, 2)])
    w_qkv_t = jnp.asarray(w_qkv).T  # (C, 3C); output cols ordered (3, H, Dh)

    def permute_head_cols(w_cols):  # (C, C) cols ordered (H, Dh)
        return w_cols.reshape(C, H, Dh)[:, :, perm].reshape(C, C)

    w_q_t = permute_head_cols(w_qkv_t[:, 0 * C:1 * C])
    w_k_t = permute_head_cols(w_qkv_t[:, 1 * C:2 * C])
    w_v_t = w_qkv_t[:, 2 * C:3 * C]
    return {
        "w_qkv_t": jnp.concatenate([w_q_t, w_k_t, w_v_t], axis=1),  # (C, 3C)
        "w_proj_t": jnp.asarray(w_proj).T,                          # (C, C)
    }


# ----------------------------------------------------------------------------
# Full forward pass (no HBM transposes anywhere in the wrapper)
# ----------------------------------------------------------------------------
def scaled_mha_forward(x, params, num_heads, *, causal=True, rope_theta=10000.0):
    B, T, C = x.shape
    H = num_heads
    Dh = C // H
    scale = Dh ** (-0.5)

    cos, sin = rope_tables(T, Dh, rope_theta)

    # qkv projection (bias=False)
    qkv2d = matmul(x.reshape(B * T, C), params["w_qkv_t"])        # (B*T, 3C)

    # RoPE (scale folded into q-side tables) + repack in one pass.
    qkv_packed = rope_repack(qkv2d.reshape(B, T, 3 * C),
                             cos * scale, sin * scale, cos, sin,
                             num_heads=H)                          # (3, B*H, T, Dh)

    # Flash attention; output comes back already in (B, T, C) layout.
    attn = flash_attention(qkv_packed, batch=B, num_heads=H, causal=causal)

    # output projection (bias=False)
    return matmul(attn.reshape(B * T, C), params["w_proj_t"]).reshape(B, T, C)


# ----------------------------------------------------------------------------
# Pure-JAX reference (mirrors the PyTorch module's intended semantics)
# ----------------------------------------------------------------------------
def _apply_rope_ref(x, cos, sin):
    # TODO(synk): the original module's cos/sin buffers are (T, Dh) which cannot
    # broadcast against x[..., ::2] of width Dh/2; we implement the clearly
    # intended interleaved-pair RoPE with cos/sin(freqs) of shape (T, Dh/2).
    x1 = x[..., 0::2]
    x2 = x[..., 1::2]
    return jnp.concatenate([x1 * cos - x2 * sin, x1 * sin + x2 * cos], axis=-1)


def mha_reference(x, w_qkv, w_proj, num_heads, *, causal=True, theta=10000.0):
    B, T, C = x.shape
    H = num_heads
    Dh = C // H
    scale = Dh ** (-0.5)
    qkv = (x @ w_qkv.T).reshape(B, T, 3, H, Dh).transpose(2, 0, 3, 1, 4)
    q, k, v = qkv[0], qkv[1], qkv[2]
    inv_freq = 1.0 / (theta ** (jnp.arange(0, Dh, 2, dtype=jnp.float32) / Dh))
    freqs = jnp.outer(jnp.arange(T, dtype=jnp.float32), inv_freq)  # (T, Dh/2)
    cos, sin = jnp.cos(freqs), jnp.sin(freqs)
    q = _apply_rope_ref(q, cos, sin)
    k = _apply_rope_ref(k, cos, sin)
    s = jnp.einsum("bhtd,bhsd->bhts", q, k) * scale
    if causal:
        s = jnp.where(jnp.tril(jnp.ones((T, T), bool)), s, -jnp.inf)
    p = jax.nn.softmax(s, axis=-1)
    o = jnp.einsum("bhts,bhsd->bhtd", p, v)
    return o.transpose(0, 2, 1, 3).reshape(B, T, C) @ w_proj.T


if __name__ == "__main__":
    # Small shapes consistent with the module: B=2, T=8, embed_dim=32, num_heads=4
    B, T, C, H = 2, 8, 32, 4

    key = jax.random.PRNGKey(0)
    k_x, k_qkv, k_proj = jax.random.split(key, 3)
    x = jax.random.normal(k_x, (B, T, C), jnp.float32)

    bound = 1.0 / (C ** 0.5)
    w_qkv = jax.random.uniform(k_qkv, (3 * C, C), jnp.float32, -bound, bound)
    w_proj = jax.random.uniform(k_proj, (C, C), jnp.float32, -bound, bound)

    params = prepare_params(w_qkv, w_proj, H)
    out = scaled_mha_forward(x, params, H, causal=True)
    out = jax.block_until_ready(out)

    ref = mha_reference(x, w_qkv, w_proj, H, causal=True)
    assert out.shape == (B, T, C)
    max_err = float(jnp.max(jnp.abs(out - ref)))
    # approx reciprocal in the softmax finalize -> slightly looser tolerance
    assert jnp.allclose(out, ref, atol=2e-3, rtol=2e-3), (
        f"mismatch vs reference (max err {max_err})")

    print("KERNEL_OK")
</pallas_src>

<mosaic_0001>
module attributes {stable_mosaic.version = 11 : i64} {
  func.func @_matmul_kernel(%arg0: i32, %arg1: i32, %arg2: i32, %arg3: memref<16x32xf32, #tpu.memory_space<vmem>>, %arg4: memref<32x96xf32, #tpu.memory_space<vmem>>, %arg5: memref<16x96xf32, #tpu.memory_space<vmem>>, %arg6: memref<16x96xf32, #tpu.memory_space<vmem>>) attributes {dimension_semantics = [#tpu.dimension_semantics<parallel>, #tpu.dimension_semantics<parallel>, #tpu.dimension_semantics<arbitrary>], iteration_bounds = array<i64: 1, 1, 1>, scalar_prefetch = 0 : i64, scratch_operands = 1 : i64, tpu.core_type = #tpu.core_type<tc>, window_params = [{transform_indices = @transform_0, window_bounds = array<i64: 16, 32>}, {transform_indices = @transform_1, window_bounds = array<i64: 32, 96>}, {transform_indices = @transform_2, window_bounds = array<i64: 16, 96>}]} {
    %c0_i32 = arith.constant 0 : i32
    %0 = arith.cmpi eq, %arg2, %c0_i32 : i32
    %1 = arith.extui %0 : i1 to i32
    %c0_i32_0 = arith.constant 0 : i32
    %2 = arith.cmpi ne, %1, %c0_i32_0 : i32
    scf.if %2 {
      %cst_10 = arith.constant 0.000000e+00 : f32
      %12 = vector.broadcast %cst_10 : f32 to vector<16x96xf32>
      %c0_11 = arith.constant 0 : index
      %c0_12 = arith.constant 0 : index
      %13 = vector.load %arg6[%c0_11, %c0_12] : memref<16x96xf32, #tpu.memory_space<vmem>>, vector<16x96xf32>
      tpu.vector_store %arg6[%c0_11, %c0_12], %12 {strides = array<i32>} : memref<16x96xf32, #tpu.memory_space<vmem>>, vector<16x96xf32>,
    } else {
    }
    %c0 = arith.constant 0 : index
    %c0_1 = arith.constant 0 : index
    %3 = vector.load %arg6[%c0, %c0_1] : memref<16x96xf32, #tpu.memory_space<vmem>>, vector<16x96xf32>
    %c0_2 = arith.constant 0 : index
    %c0_3 = arith.constant 0 : index
    %4 = vector.load %arg3[%c0_2, %c0_3] : memref<16x32xf32, #tpu.memory_space<vmem>>, vector<16x32xf32>
    %c0_4 = arith.constant 0 : index
    %c0_5 = arith.constant 0 : index
    %5 = vector.load %arg4[%c0_4, %c0_5] : memref<32x96xf32, #tpu.memory_space<vmem>>, vector<32x96xf32>
    %cst = arith.constant dense<0.000000e+00> : vector<16x96xf32>
    %6 = tpu.matmul %4, %5, %cst {dimension_numbers = #tpu.dot_dimension_numbers<[1], [0], [0], [1], [0, 0, 1, 1], [], []>} : vector<16x32xf32>, vector<32x96xf32>, vector<16x96xf32> -> vector<16x96xf32>
    %7 = arith.addf %3, %6 : vector<16x96xf32>
    %c0_6 = arith.constant 0 : index
    %c0_7 = arith.constant 0 : index
    %8 = vector.load %arg6[%c0_6, %c0_7] : memref<16x96xf32, #tpu.memory_space<vmem>>, vector<16x96xf32>
    tpu.vector_store %arg6[%c0_6, %c0_7], %7 {strides = array<i32>} : memref<16x96xf32, #tpu.memory_space<vmem>>, vector<16x96xf32>,
    %c0_i32_8 = arith.constant 0 : i32
    %9 = arith.cmpi eq, %arg2, %c0_i32_8 : i32
    %10 = arith.extui %9 : i1 to i32
    %c0_i32_9 = arith.constant 0 : i32
    %11 = arith.cmpi ne, %10, %c0_i32_9 : i32
    scf.if %11 {
      %c0_10 = arith.constant 0 : index
      %c0_11 = arith.constant 0 : index
      %12 = vector.load %arg6[%c0_10, %c0_11] : memref<16x96xf32, #tpu.memory_space<vmem>>, vector<16x96xf32>
      %c0_12 = arith.constant 0 : index
      %c0_13 = arith.constant 0 : index
      %13 = vector.load %arg5[%c0_12, %c0_13] : memref<16x96xf32, #tpu.memory_space<vmem>>, vector<16x96xf32>
      tpu.vector_store %arg5[%c0_12, %c0_13], %12 {strides = array<i32>} : memref<16x96xf32, #tpu.memory_space<vmem>>, vector<16x96xf32>,
    } else {
    }
    return
  }
  func.func @transform_0(%arg0: i32, %arg1: i32, %arg2: i32) -> (i32, i32) {
    %c0_i32 = arith.constant 0 : i32
    return %arg0, %arg2 : i32, i32
  }
  func.func @transform_1(%arg0: i32, %arg1: i32, %arg2: i32) -> (i32, i32) {
    %c0_i32 = arith.constant 0 : i32
    return %arg2, %arg1 : i32, i32
  }
  func.func @transform_2(%arg0: i32, %arg1: i32, %arg2: i32) -> (i32, i32) {
    %c0_i32 = arith.constant 0 : i32
    return %arg0, %arg1 : i32, i32
  }
}

</mosaic_0001>

<bundles_post_ra>
// kernel: tpu_custom_call.1
= control target key start
LH: loop header
LB: loop body
LE: loop exit
PB: predicated region body
PF: predicated region fallthrough
CT: control target
= control target key end

     0   :  { %7 = vsyncpa [#allocation4], 0  ;;  %s344_s0 = inlined_call_operand.hbm [shape: f32[16,32], index: 0, kind: input, shape index: {}]   ;;  %s345_s1 = inlined_call_operand.hbm [shape: f32[32,96], index: 1, kind: input, shape index: {}]   ;;  %s346_s2 = inlined_call_operand.hbm [shape: f32[16,96], index: 2, kind: output, shape index: {}]  }
   0x1   :  { %8 = vsyncpa [#allocation7], 0 }
   0x2   :  { %9 = vsyncpa [#allocation5], 0  ;;  %s272_s9 = smov [#allocation3]   ;;  %s200_s13 = scalar_lea.hbm %s344_s0, 256 }
   0x3   :  { %s15_s10 = sshll.u32 %s272_s9, 4  ;;  %p201_p0 = scmp.ne.s32.totalorder %s344_s0, %s200_s13  ;;  %s16_s10 = int_to_ptr.vmem [resolvable:$true] %s15_s10 }
   0x4   :  { %p204_p1 = scmp.lt.u32.totalorder %s200_s13, %s344_s0 }
   0x6   :  { %p206_p2 = pnand %p204_p1, %p201_p0 }
   0x8   :  { %209 = shalt.err (!%p206_p2)
}
   0x9   :  { %s210_s18 = scalar_lea.vmem %s16_s10, 256  ;;  %p215_p4 = scmp.lt.s32.totalorder %s16_s10, %s16_s10 }
   0xa   :  { %p211_p3 = scmp.ne.s32.totalorder %s16_s10, %s210_s18  ;;  %p216_p5 = scmp.lt.s32.totalorder %s210_s18, %s210_s18 }
   0xc   :  { %p217_p6 = por %p216_p5, %p215_p4 }
   0xe   :  { %p218_p7 = pnand %p217_p6, %p211_p3 }
  0x10   :  { %221 = shalt.err (!%p218_p7)
}
  0x11   :  { %s273_s19 = smov 128   ;;  %s274_s20 = smov 8  }
  0x12   :  { %21 = dma.hbm_to_vmem [thread:$0]  %s344_s0, 256, %s16_s10, [#allocation4], %s273_s19, %s273_s19, %s274_s20  }
  0x13   :  { %s275_s23 = smov [#allocation6]   ;;  %s222_s27 = scalar_lea.hbm %s345_s1, 512 }
  0x14   :  { %s27_s24 = sshll.u32 %s275_s23, 4  ;;  %p223_p8 = scmp.ne.s32.totalorder %s345_s1, %s222_s27  ;;  %s28_s24 = int_to_ptr.vmem [resolvable:$true] %s27_s24 }
  0x15   :  { %p226_p9 = scmp.lt.u32.totalorder %s222_s27, %s345_s1 }
  0x17   :  { %p228_p10 = pnand %p226_p9, %p223_p8 }
  0x19   :  { %231 = shalt.err (!%p228_p10)
}
  0x1a   :  { %s232_s4 = scalar_lea.vmem %s28_s24, 512  ;;  %p237_p12 = scmp.lt.s32.totalorder %s28_s24, %s28_s24 }
  0x1b   :  { %p233_p11 = scmp.ne.s32.totalorder %s28_s24, %s232_s4  ;;  %p238_p13 = scmp.lt.s32.totalorder %s232_s4, %s232_s4 }
  0x1d   :  { %p239_p0 = por %p238_p13, %p237_p12 }
  0x1f   :  { %p240_p1 = pnand %p239_p0, %p233_p11 }
  0x21   :  { %243 = shalt.err (!%p240_p1)
}
  0x22   :  { %33 = dma.hbm_to_vmem [thread:$0]  %s345_s1, 512, %s28_s24, [#allocation7], %s273_s19, %s273_s19, %s274_s20  }
  0x23   :  { %266 = dma.done.wait [#allocation4], 256  }
  0x24   :  { %267 = vsyncadd [#allocation4], 4294967040 }
  0x25   :  { %268 = dma.done.wait [#allocation7], 512  }
  0x26   :  { %269 = vsyncadd [#allocation7], 4294966784  ;;  %vm44_vm0 = vcmask 785408   ;;  %v276_v0 = vmov 0.0   ;;  %vm55_vm1 = vcmask 261120   ;;  %v51_v1 = vld [vmem:[#allocation6] sm:$0xff] }
  0x27   :  { %46 = vst.msk [vmem:[#allocation2 + $0x8] sm:$0xff] %vm44_vm0, %v276_v0  ;;  %45 = vst.msk [vmem:[#allocation2] sm:$0xff] %vm44_vm0, %v276_v0  ;;  %v52_v2 = vld [vmem:[#allocation6 + $0x8] sm:$0xff]  ;;  %v53_v3 = vld [vmem:[#allocation6 + $0x10] sm:$0xff]  ;;  %s277_s1 = smov [#allocation8]  }
  0x28   :  { %v186_v4 = vpack.c.bf16 %v52_v2, %v51_v1  ;;  %v54_v5 = vld [vmem:[#allocation6 + $0x18] sm:$0xff]  ;;  %v49_v6 = vld [vmem:[#allocation3] sm:$0xff]  ;;  %s154_s6 = sshll.u32 %s277_s1, 4  ;;  %s155_s6 = int_to_ptr.vmem [resolvable:$true] %s154_s6 }
  0x29   :  { %v190_v7 = vpack.c.bf16 %v54_v5, %v53_v3  ;;  %183 = vmatprep.mubr.msk.f32.mxu0 %vm55_vm1, %v49_v6  ;;  %v50_v8 = vld [vmem:[#allocation3 + $0x8] sm:$0xff]  ;;  %s244_s7 = scalar_lea.vmem %s155_s6, 256  ;;  %p249_p3 = scmp.lt.s32.totalorder %s155_s6, %s155_s6 }
  0x2a   :  { %187 = vmatprep.subr.bf16.mxu0 %v186_v4  ;;  %p245_p2 = scmp.ne.s32.totalorder %s155_s6, %s244_s7  ;;  %p250_p4 = scmp.lt.s32.totalorder %s244_s7, %s244_s7 }
  0x2b   :  { %189 = vmatpush3.bf16.msra.mxu0 %v186_v4 }
  0x2c   :  { %191 = vmatprep.subr.bf16.mxu0 %v190_v7  ;;  %p251_p5 = por %p250_p4, %p249_p3 }
  0x2e   :  { %v48_v9 = vld [vmem:[#allocation2 + $0x8] sm:$0xff]  ;;  %v47_v10 = vld [vmem:[#allocation2] sm:$0xff]  ;;  %p252_p6 = pnand %p251_p5, %p245_p2 }
  0x2f   :  { %193 = vmatpush3.bf16.msra.mxu0 %v190_v7 }
  0x32   :  { %184 = vmatmul.mubr.msk.f32.vlgmr.msra.gmra.mrb[0].mxu0 %vm55_vm1, %v50_v8 }
 0x105   :  { %v185_v11 = vpop.f32.mrb[0].mxu0 }
 0x106   :  { %v138_v12 = vadd.f32 %v185_v11, %v48_v9  ;;  %v128_v13 = vpop.f32.mrb[1].mxu0 }
 0x107   :  { %v137_v14 = vadd.f32 %v128_v13, %v47_v10 }
 0x108   :  { %141 = vst.msk [vmem:[#allocation2 + $0x8] sm:$0xff] %vm44_vm0, %v138_v12 }
 0x109   :  { %140 = vst.msk [vmem:[#allocation2] sm:$0xff] %vm44_vm0, %v137_v14 }
 0x10f   :  { %v146_v15 = vld [vmem:[#allocation2 + $0x8] sm:$0xff] }
 0x110   :  { %v145_v16 = vld [vmem:[#allocation2] sm:$0xff]  ;;  %148 = vst.msk [vmem:[#allocation8 + $0x8] sm:$0xff] %vm44_vm0, %v146_v15 }
 0x111   :  { %147 = vst.msk [vmem:[#allocation8] sm:$0xff] %vm44_vm0, %v145_v16 }
 0x112   :  { %255 = shalt.err (!%p252_p6)
}
 0x113   :  { %s256_s10 = scalar_lea.hbm %s346_s2, 256 }
 0x114   :  { %p257_p7 = scmp.ne.s32.totalorder %s346_s2, %s256_s10  ;;  %p260_p8 = scmp.lt.u32.totalorder %s256_s10, %s346_s2 }
 0x116   :  { %p262_p9 = pnand %p260_p8, %p257_p7 }
 0x118   :  { %265 = shalt.err (!%p262_p9)
}
 0x119   :  { %160 = dma.vmem_to_hbm [thread:$0]  %s155_s6, 256, %s346_s2, [#allocation5], %s273_s19, %s273_s19, %s274_s20  }
 0x11a   :  { %270 = dma.done.wait [#allocation5], 256  }
 0x11b   :  { %271 = vsyncadd [#allocation5], 4294967040 }
 0x11c   :  { %164 = vsyncpa [#allocation4], 1 }
 0x11d   :  { %165 = vsyncpa [#allocation7], 1 }
 0x11e   :  { %166 = vsyncpa [#allocation5], 1 }

</bundles_post_ra>
